<compile_context>
chip_gen: v6e
topology: v6e:2x2x1
jax: 0.10.0
libtpu: 0.0.40
codegen_flags: <defaults>
</compile_context>

<pallas_src>
import functools

import jax
import jax.numpy as jnp
from jax.experimental import pallas as pl
from jax.experimental.pallas import tpu as pltpu


def linear_relu_kernel(x_ref, w_ref, b_ref, o_ref, acc_ref):
    # x_ref: (tm, tk) bf16; w_ref: (tk, tn) bf16; b_ref: (1, tn) f32
    # o_ref: (tm, tn) f32;  acc_ref: (tm, tn) f32 scratch (lives across K steps)
    k = pl.program_id(2)

    @pl.when(k == 0)
    def _init():
        acc_ref[...] = jnp.zeros_like(acc_ref)

    # bf16 x bf16 -> f32 accumulation on the MXU.
    acc_ref[...] += jnp.dot(x_ref[...], w_ref[...],
                            preferred_element_type=jnp.float32)

    @pl.when(k == pl.num_programs(2) - 1)
    def _finalize():
        y = acc_ref[...] + b_ref[...]                  # bias add in f32 (VPU)
        o_ref[...] = jnp.maximum(y, 0.0).astype(o_ref.dtype)


def _round_up(x, m):
    return ((x + m - 1) // m) * m


def prepare_linear_params(weight, bias):
    """One-time parameter prep (at init, NOT per forward call).

    PyTorch layout [out_dim, in_dim] -> transposed [in_dim, n_pad] bf16, with
    the N dimension padded up to a multiple of 128 so outputs are lane-dense.
    Bias -> [1, n_pad] f32 (zero-padded)."""
    out_dim, in_dim = weight.shape
    n_pad = _round_up(out_dim, 128)
    w_t = jnp.zeros((in_dim, n_pad), dtype=jnp.bfloat16)
    w_t = w_t.at[:, :out_dim].set(weight.T.astype(jnp.bfloat16))
    b = jnp.zeros((1, n_pad), dtype=jnp.float32)
    b = b.at[:, :out_dim].set(bias.astype(jnp.float32))
    return w_t, b


@functools.partial(jax.jit, static_argnames=("out_dim",))
def my_network_block(x, w_t, b, out_dim):
    """x: [B, in_dim] f32; w_t: [in_dim, n_pad] bf16 (prepared); b: [1, n_pad] f32."""
    B, in_dim = x.shape
    n_pad = w_t.shape[1]

    # Tile selection (static on shapes). At the toy size this collapses to
    # full-array tiles / grid=(1,1,1); at larger shapes it gives real tiling
    # that stays well within v7x's 64 MiB VMEM with double-buffering.
    tm = 256 if (B > 256 and B % 256 == 0) else B
    tn = 256 if n_pad % 256 == 0 else 128
    tk = 512 if (in_dim > 512 and in_dim % 512 == 0) else in_dim
    grid = (B // tm, n_pad // tn, in_dim // tk)

    x_bf16 = x.astype(jnp.bfloat16)

    flops = 2 * B * in_dim * n_pad
    bytes_accessed = (B * in_dim * 2          # x (bf16)
                      + in_dim * n_pad * 2    # w (bf16)
                      + n_pad * 4             # bias (f32)
                      + B * n_pad * 4)        # out (f32)

    out_padded = pl.pallas_call(
        linear_relu_kernel,
        out_shape=jax.ShapeDtypeStruct((B, n_pad), jnp.float32),
        grid_spec=pltpu.PrefetchScalarGridSpec(
            num_scalar_prefetch=0,
            grid=grid,
            in_specs=[
                pl.BlockSpec((tm, tk), lambda i, j, k: (i, k)),
                pl.BlockSpec((tk, tn), lambda i, j, k: (k, j)),
                pl.BlockSpec((1, tn), lambda i, j, k: (0, j)),
            ],
            out_specs=pl.BlockSpec((tm, tn), lambda i, j, k: (i, j)),
            scratch_shapes=[pltpu.VMEM((tm, tn), jnp.float32)],
        ),
        compiler_params=pltpu.CompilerParams(
            dimension_semantics=("parallel", "parallel", "arbitrary"),
        ),
        cost_estimate=pl.CostEstimate(
            flops=flops, transcendentals=0, bytes_accessed=bytes_accessed),
    )(x_bf16, w_t, b)

    # Strip the N padding back to the logical out_dim (cheap XLA slice).
    return out_padded[:, :out_dim]


if __name__ == "__main__":
    in_dim = 512
    out_dim = 10
    batch_size = 32

    key = jax.random.PRNGKey(0)
    kx, kw, kb = jax.random.split(key, 3)

    # Deterministic parameter init (mimics torch.nn.Linear's uniform bound).
    bound = 1.0 / (in_dim ** 0.5)
    x = jax.random.normal(kx, (batch_size, in_dim), dtype=jnp.float32)
    weight = jax.random.uniform(kw, (out_dim, in_dim), dtype=jnp.float32,
                                minval=-bound, maxval=bound)
    bias = jax.random.uniform(kb, (out_dim,), dtype=jnp.float32,
                              minval=-bound, maxval=bound)

    # One-time, init-time parameter preparation (pad + transpose + bf16 cast).
    w_t, b_pad = prepare_linear_params(weight, bias)

    out = my_network_block(x, w_t, b_pad, out_dim)
    out = jax.block_until_ready(out)
    assert out.shape == (batch_size, out_dim)

    # Reference with matching bf16 operand rounding (f32 accumulation): tight check.
    ref_bf16 = jnp.maximum(
        jnp.dot(x.astype(jnp.bfloat16).astype(jnp.float32),
                weight.T.astype(jnp.bfloat16).astype(jnp.float32)) + bias, 0.0)
    assert jnp.allclose(out, ref_bf16, atol=1e-3, rtol=1e-3)

    # Loose sanity check against the full-f32 reference (bf16 operand error only).
    ref_f32 = jnp.maximum(x @ weight.T + bias, 0.0)
    assert jnp.allclose(out, ref_f32, atol=5e-2, rtol=5e-2)

    print("KERNEL_OK")
</pallas_src>

<mosaic_0001>
module attributes {stable_mosaic.version = 11 : i64} {
  func.func @linear_relu_kernel(%arg0: i32, %arg1: i32, %arg2: i32, %arg3: memref<32x512xbf16, #tpu.memory_space<vmem>>, %arg4: memref<512x128xbf16, #tpu.memory_space<vmem>>, %arg5: memref<1x128xf32, #tpu.memory_space<vmem>>, %arg6: memref<32x128xf32, #tpu.memory_space<vmem>>, %arg7: memref<32x128xf32, #tpu.memory_space<vmem>>) attributes {dimension_semantics = [#tpu.dimension_semantics<parallel>, #tpu.dimension_semantics<parallel>, #tpu.dimension_semantics<arbitrary>], iteration_bounds = array<i64: 1, 1, 1>, scalar_prefetch = 0 : i64, scratch_operands = 1 : i64, tpu.core_type = #tpu.core_type<tc>, window_params = [{transform_indices = @transform_0, window_bounds = array<i64: 32, 512>}, {transform_indices = @transform_1, window_bounds = array<i64: 512, 128>}, {transform_indices = @transform_2, window_bounds = array<i64: 1, 128>}, {transform_indices = @transform_3, window_bounds = array<i64: 32, 128>}]} {
    %c0_i32 = arith.constant 0 : i32
    %0 = arith.cmpi eq, %arg2, %c0_i32 : i32
    %1 = arith.extui %0 : i1 to i32
    %c0_i32_0 = arith.constant 0 : i32
    %2 = arith.cmpi ne, %1, %c0_i32_0 : i32
    scf.if %2 {
      %cst_10 = arith.constant 0.000000e+00 : f32
      %12 = vector.broadcast %cst_10 : f32 to vector<32x128xf32>
      %c0_11 = arith.constant 0 : index
      %c0_12 = arith.constant 0 : index
      %13 = vector.load %arg7[%c0_11, %c0_12] : memref<32x128xf32, #tpu.memory_space<vmem>>, vector<32x128xf32>
      tpu.vector_store %arg7[%c0_11, %c0_12], %12 {strides = array<i32>} : memref<32x128xf32, #tpu.memory_space<vmem>>, vector<32x128xf32>,
    } else {
    }
    %c0 = arith.constant 0 : index
    %c0_1 = arith.constant 0 : index
    %3 = vector.load %arg7[%c0, %c0_1] : memref<32x128xf32, #tpu.memory_space<vmem>>, vector<32x128xf32>
    %c0_2 = arith.constant 0 : index
    %c0_3 = arith.constant 0 : index
    %4 = vector.load %arg3[%c0_2, %c0_3] : memref<32x512xbf16, #tpu.memory_space<vmem>>, vector<32x512xbf16>
    %c0_4 = arith.constant 0 : index
    %c0_5 = arith.constant 0 : index
    %5 = vector.load %arg4[%c0_4, %c0_5] : memref<512x128xbf16, #tpu.memory_space<vmem>>, vector<512x128xbf16>
    %cst = arith.constant dense<0.000000e+00> : vector<32x128xf32>
    %6 = tpu.matmul %4, %5, %cst {dimension_numbers = #tpu.dot_dimension_numbers<[1], [0], [0], [1], [0, 0, 1, 1], [], []>} : vector<32x512xbf16>, vector<512x128xbf16>, vector<32x128xf32> -> vector<32x128xf32>
    %7 = arith.addf %3, %6 : vector<32x128xf32>
    %c0_6 = arith.constant 0 : index
    %c0_7 = arith.constant 0 : index
    %8 = vector.load %arg7[%c0_6, %c0_7] : memref<32x128xf32, #tpu.memory_space<vmem>>, vector<32x128xf32>
    tpu.vector_store %arg7[%c0_6, %c0_7], %7 {strides = array<i32>} : memref<32x128xf32, #tpu.memory_space<vmem>>, vector<32x128xf32>,
    %c0_i32_8 = arith.constant 0 : i32
    %9 = arith.cmpi eq, %arg2, %c0_i32_8 : i32
    %10 = arith.extui %9 : i1 to i32
    %c0_i32_9 = arith.constant 0 : i32
    %11 = arith.cmpi ne, %10, %c0_i32_9 : i32
    scf.if %11 {
      %c0_10 = arith.constant 0 : index
      %c0_11 = arith.constant 0 : index
      %12 = vector.load %arg7[%c0_10, %c0_11] : memref<32x128xf32, #tpu.memory_space<vmem>>, vector<32x128xf32>
      %c0_12 = arith.constant 0 : index
      %c0_13 = arith.constant 0 : index
      %13 = vector.load %arg5[%c0_12, %c0_13] : memref<1x128xf32, #tpu.memory_space<vmem>>, vector<1x128xf32>
      %14 = vector.broadcast %13 : vector<1x128xf32> to vector<32x128xf32>
      %15 = arith.addf %12, %14 : vector<32x128xf32>
      %cst_14 = arith.constant 0.000000e+00 : f32
      %16 = vector.broadcast %cst_14 : f32 to vector<32x128xf32>
      %17 = arith.maximumf %15, %16 : vector<32x128xf32>
      %c0_15 = arith.constant 0 : index
      %c0_16 = arith.constant 0 : index
      %18 = vector.load %arg6[%c0_15, %c0_16] : memref<32x128xf32, #tpu.memory_space<vmem>>, vector<32x128xf32>
      tpu.vector_store %arg6[%c0_15, %c0_16], %17 {strides = array<i32>} : memref<32x128xf32, #tpu.memory_space<vmem>>, vector<32x128xf32>,
    } else {
    }
    return
  }
  func.func @transform_0(%arg0: i32, %arg1: i32, %arg2: i32) -> (i32, i32) {
    %c0_i32 = arith.constant 0 : i32
    return %arg0, %arg2 : i32, i32
  }
  func.func @transform_1(%arg0: i32, %arg1: i32, %arg2: i32) -> (i32, i32) {
    %c0_i32 = arith.constant 0 : i32
    return %arg2, %arg1 : i32, i32
  }
  func.func @transform_2(%arg0: i32, %arg1: i32, %arg2: i32) -> (i32, i32) {
    %c0_i32 = arith.constant 0 : i32
    %c0_i32_0 = arith.constant 0 : i32
    return %c0_i32, %arg1 : i32, i32
  }
  func.func @transform_3(%arg0: i32, %arg1: i32, %arg2: i32) -> (i32, i32) {
    %c0_i32 = arith.constant 0 : i32
    return %arg0, %arg1 : i32, i32
  }
}

</mosaic_0001>

<bundles_post_ra>
// kernel: my_network_block.1
= control target key start
LH: loop header
LB: loop body
LE: loop exit
PB: predicated region body
PF: predicated region fallthrough
CT: control target
= control target key end

     0   :  { %8 = vsyncpa [#allocation4], 0  ;;  %s648_s12 = smov [#allocation3]   ;;  %s713_s0 = inlined_call_operand.vmem [shape: bf16[32,512], index: 0, kind: input, shape index: {}]   ;;  %s714_s1 = inlined_call_operand.hbm [shape: bf16[512,128], index: 1, kind: input, shape index: {}]   ;;  %s715_s2 = inlined_call_operand.vmem [shape: f32[1,128], index: 2, kind: input, shape index: {}]   ;;  %s716_s3 = inlined_call_operand.vmem [shape: f32[32,128], index: 3, kind: output, shape index: {}]  }
   0x1   :  { %s16_s13 = sshll.u32 %s648_s12, 4  ;;  %s17_s13 = int_to_ptr.vmem [resolvable:$true] %s16_s13 }
   0x2   :  { %s634_s14 = scalar_lea.vmem %s17_s13, 4096  ;;  %p639_p1 = scmp.lt.s32.totalorder %s17_s13, %s17_s13 }
   0x3   :  { %p635_p0 = scmp.ne.s32.totalorder %s17_s13, %s634_s14  ;;  %p640_p2 = scmp.lt.s32.totalorder %s634_s14, %s634_s14 }
   0x5   :  { %p641_p3 = por %p640_p2, %p639_p1 }
   0x7   :  { %p642_p4 = pnand %p641_p3, %p635_p0 }
   0x9   :  { %645 = shalt.err (!%p642_p4)
}
   0xa   :  { %s649_s15 = smov 64   ;;  %s650_s16 = smov 4  }
   0xb   :  { %22 = dma.hbm_to_vmem [thread:$0]  %s714_s1, 4096, %s17_s13, [#allocation4], %s649_s15, %s649_s15, %s650_s16  }
   0xc   :  { %646 = dma.done.wait [#allocation4], 4096  }
   0xd   :  { %647 = vsyncadd [#allocation4], 4294963200  ;;  %v582_v0 = vld [vmem:[#allocation3 + $0x78] sm:$0xff]   ;;  %v586_v4 = vld [vmem:[#allocation3 + $0x70] sm:$0xff]  }
   0xe   :  { %v583_v1 = vld [vmem:[#allocation3 + $0xf8] sm:$0xff]   ;;  %523 = vmatprep.subr.bf16.mxu0 %v582_v0  ;;  %v587_v5 = vld [vmem:[#allocation3 + $0xf0] sm:$0xff]   ;;  %v590_v8 = vld [vmem:[#allocation3 + $0x68] sm:$0xff]  }
   0xf   :  { %v584_v2 = vld [vmem:[#allocation3 + $0x38] sm:$0xff]   ;;  %551 = vmatprep.subr.bf16.mxu1 %v583_v1  ;;  %v588_v6 = vld [vmem:[#allocation3 + $0x30] sm:$0xff]   ;;  %v591_v9 = vld [vmem:[#allocation3 + $0xe8] sm:$0xff]  }
  0x10   :  { %v585_v3 = vld [vmem:[#allocation3 + $0xb8] sm:$0xff]   ;;  %524 = vmatpush3.bf16.msra.mxu0 %v584_v2  ;;  %v589_v7 = vld [vmem:[#allocation3 + $0xb0] sm:$0xff]   ;;  %v592_v10 = vld [vmem:[#allocation3 + $0x28] sm:$0xff]  }
  0x11   :  { %552 = vmatpush3.bf16.msra.mxu1 %v585_v3  ;;  %525 = vmatprep.subr.bf16.mxu0 %v586_v4  ;;  %v593_v11 = vld [vmem:[#allocation3 + $0xa8] sm:$0xff]   ;;  %v594_v12 = vld [vmem:[#allocation3 + $0x60] sm:$0xff]   ;;  %v598_v16 = vld [vmem:[#allocation3 + $0x58] sm:$0xff]  }
  0x12   :  { %553 = vmatprep.subr.bf16.mxu1 %v587_v5  ;;  %v595_v13 = vld [vmem:[#allocation3 + $0xe0] sm:$0xff]   ;;  %v599_v17 = vld [vmem:[#allocation3 + $0xd8] sm:$0xff]   ;;  %v602_v20 = vld [vmem:[#allocation3 + $0x50] sm:$0xff]  }
  0x13   :  { %v596_v14 = vld [vmem:[#allocation3 + $0x20] sm:$0xff]   ;;  %v600_v18 = vld [vmem:[#allocation3 + $0x18] sm:$0xff]   ;;  %v603_v21 = vld [vmem:[#allocation3 + $0xd0] sm:$0xff]  }
  0x14   :  { %526 = vmatpush3.bf16.msra.mxu0 %v588_v6  ;;  %v597_v15 = vld [vmem:[#allocation3 + $0xa0] sm:$0xff]   ;;  %v601_v19 = vld [vmem:[#allocation3 + $0x98] sm:$0xff]   ;;  %v604_v22 = vld [vmem:[#allocation3 + $0x10] sm:$0xff]  }
  0x15   :  { %554 = vmatpush3.bf16.msra.mxu1 %v589_v7  ;;  %527 = vmatprep.subr.bf16.mxu0 %v590_v8  ;;  %v605_v23 = vld [vmem:[#allocation3 + $0x90] sm:$0xff]   ;;  %v606_v24 = vld [vmem:[#allocation3 + $0x48] sm:$0xff]   ;;  %v610_v28 = vld [vmem:[#allocation3 + $0x40] sm:$0xff]  }
  0x16   :  { %555 = vmatprep.subr.bf16.mxu1 %v591_v9  ;;  %v607_v25 = vld [vmem:[#allocation3 + $0xc8] sm:$0xff]   ;;  %v611_v29 = vld [vmem:[#allocation3 + $0xc0] sm:$0xff]  }
  0x17   :  { %v608_v26 = vld [vmem:[#allocation3 + $0x8] sm:$0xff]   ;;  %v612_v30 = vld [vmem:[#allocation3] sm:$0xff]  }
  0x18   :  { %528 = vmatpush3.bf16.msra.mxu0 %v592_v10  ;;  %v609_v27 = vld [vmem:[#allocation3 + $0x88] sm:$0xff]   ;;  %v613_v31 = vld [vmem:[#allocation3 + $0x80] sm:$0xff]  }
  0x19   :  { %556 = vmatpush3.bf16.msra.mxu1 %v593_v11  ;;  %529 = vmatprep.subr.bf16.mxu0 %v594_v12  ;;  %v614_v32 = vld [vmem:[%s713_s0] ss:$16 sps:$4 sm:$0xff]   ;;  %v616_v33 = vld [vmem:[%s713_s0 + $0x4] ss:$16 sps:$4 sm:$0xff]   ;;  %v617_v34 = vld [vmem:[%s713_s0 + $0x8] ss:$16 sps:$4 sm:$0xff]  }
  0x1a   :  { %557 = vmatprep.subr.bf16.mxu1 %v595_v13  ;;  %v619_v35 = vld [vmem:[%s713_s0 + $0xc] ss:$16 sps:$4 sm:$0xff]   ;;  %377 = vmatprep.mubr.bf16.mxu0 %v616_v33  ;;  %v620_v36 = vld [vmem:[%s713_s0 + $0x24] ss:$16 sps:$4 sm:$0xff]   ;;  %v624_v38 = vld [vmem:[%s713_s0 + $0x20] ss:$16 sps:$4 sm:$0xff]  }
  0x1b   :  { %426 = vmatprep.mubr.bf16.mxu1 %v619_v35  ;;  %v622_v37 = vld [vmem:[%s713_s0 + $0x2c] ss:$16 sps:$4 sm:$0xff]   ;;  %v625_v39 = vld [vmem:[%s713_s0 + $0x28] ss:$16 sps:$4 sm:$0xff]   ;;  %v522_v47 = vld [vmem:[%s715_s2] ss:$0 sm:$0xff] }
  0x1c   :  { %530 = vmatpush3.bf16.msra.mxu0 %v596_v14 }
  0x1d   :  { %558 = vmatpush3.bf16.msra.mxu1 %v597_v15  ;;  %531 = vmatprep.subr.bf16.mxu0 %v598_v16 }
  0x1e   :  { %559 = vmatprep.subr.bf16.mxu1 %v599_v17 }
  0x20   :  { %532 = vmatpush3.bf16.msra.mxu0 %v600_v18 }
  0x21   :  { %560 = vmatpush3.bf16.msra.mxu1 %v601_v19  ;;  %533 = vmatprep.subr.bf16.mxu0 %v602_v20 }
  0x22   :  { %561 = vmatprep.subr.bf16.mxu1 %v603_v21 }
  0x24   :  { %534 = vmatpush3.bf16.msra.mxu0 %v604_v22 }
  0x25   :  { %562 = vmatpush3.bf16.msra.mxu1 %v605_v23  ;;  %535 = vmatprep.subr.bf16.mxu0 %v606_v24 }
  0x26   :  { %563 = vmatprep.subr.bf16.mxu1 %v607_v25 }
  0x28   :  { %536 = vmatpush3.bf16.msra.mxu0 %v608_v26 }
  0x29   :  { %564 = vmatpush3.bf16.msra.mxu1 %v609_v27  ;;  %537 = vmatprep.subr.bf16.mxu0 %v610_v28 }
  0x2a   :  { %565 = vmatprep.subr.bf16.mxu1 %v611_v29 }
  0x2c   :  { %538 = vmatpush3.bf16.msra.mxu0 %v612_v30 }
  0x2d   :  { %566 = vmatpush3.bf16.msra.mxu1 %v613_v31 }
  0x2f   :  { %378 = vmatmul.mubr.bf16.vlgmr.msra.gmra.mxu0 %v614_v32 }
  0x30   :  { %427 = vmatmul.mubr.bf16.vlgmr.msra.gmra.mxu1 %v617_v34  ;;  %385 = vmatprep.mubr.bf16.mxu0 %v620_v36 }
  0x31   :  { %434 = vmatprep.mubr.bf16.mxu1 %v622_v37 }
  0x37   :  { %386 = vmatmul.mubr.bf16.gmra.mxu0 %v624_v38 }
  0x38   :  { %435 = vmatmul.mubr.bf16.gmra.mxu1 %v625_v39 }
  0xef   :  { %v539_v40 = vpop.f32.mrf.mxu0 }
  0xf0   :  { %v567_v41 = vpop.f32.mrf.mxu1 }
  0xf1   :  { %v540_v42 = vpop.f32.mrf.mxu0 }
  0xf2   :  { %v541_v43 = vadd.f32 %v540_v42, %v539_v40  ;;  %v568_v44 = vpop.f32.mrf.mxu1 }
  0xf3   :  { %v569_v45 = vadd.f32 %v568_v44, %v567_v41  ;;  %v542_v46 = vpop.f32.mrf.mxu0 }
  0xf4   :  { %v570_v48 = vpop.f32.mrf.mxu1 }
  0xf5   :  { %v429_v49 = vadd.f32 %v569_v45, %v541_v43  ;;  %v543_v50 = vpop.f32.mrf.mxu0 }
  0xf6   :  { %v544_v51 = vadd.f32 %v543_v50, %v542_v46  ;;  %v571_v52 = vpop.f32.mrf.mxu1 }
  0xf7   :  { %v465_v53 = vadd.f32 %v522_v47, %v429_v49  ;;  %v572_v54 = vadd.f32 %v571_v52, %v570_v48  ;;  %v545_v55 = vpop.f32.mrf.mxu0 }
  0xf8   :  { %v573_v56 = vpop.f32.mrf.mxu1 }
  0xf9   :  { %v469_v57 = vmax.f32 %v465_v53, 0.0  ;;  %v432_v58 = vadd.f32 %v572_v54, %v544_v51  ;;  %v546_v59 = vpop.f32.mrf.mxu0 }
  0xfa   :  { %v547_v60 = vadd.f32 %v546_v59, %v545_v55  ;;  %v574_v61 = vpop.f32.mrf.mxu1 }
  0xfb   :  { %473 = vst [vmem:[%s716_s3] sm:$0xff] %v469_v57  ;;  %v466_v62 = vadd.f32 %v522_v47, %v432_v58  ;;  %v575_v63 = vadd.f32 %v574_v61, %v573_v56  ;;  %v548_v0 = vpop.f32.mrf.mxu0 }
  0xfc   :  { %v576_v1 = vpop.f32.mrf.mxu1 }
  0xfd   :  { %v470_v2 = vmax.f32 %v466_v62, 0.0  ;;  %v437_v3 = vadd.f32 %v575_v63, %v547_v60  ;;  %v549_v4 = vpop.f32.mrf.mxu0 }
  0xfe   :  { %v550_v5 = vadd.f32 %v549_v4, %v548_v0  ;;  %v577_v6 = vpop.f32.mrf.mxu1 }
  0xff   :  { %474 = vst [vmem:[%s716_s3 + $0x8] sm:$0xff] %v470_v2  ;;  %v467_v7 = vadd.f32 %v522_v47, %v437_v3  ;;  %v578_v8 = vadd.f32 %v577_v6, %v576_v1 }
 0x101   :  { %v471_v9 = vmax.f32 %v467_v7, 0.0  ;;  %v440_v10 = vadd.f32 %v578_v8, %v550_v5 }
 0x103   :  { %475 = vst [vmem:[%s716_s3 + $0x10] sm:$0xff] %v471_v9  ;;  %v468_v11 = vadd.f32 %v522_v47, %v440_v10 }
 0x105   :  { %v472_v12 = vmax.f32 %v468_v11, 0.0 }
 0x107   :  { %476 = vst [vmem:[%s716_s3 + $0x18] sm:$0xff] %v472_v12 }
 0x108   :  { %481 = vsyncpa [#allocation4], 1 }

</bundles_post_ra>
